<compile_context>
chip_gen: v7x
topology: tpu7x:2x2x1
jax: 0.10.0
libtpu: 0.0.40
codegen_flags: <defaults>
</compile_context>

<pallas_src>
import functools

import jax
import jax.numpy as jnp
from jax import lax
from jax.experimental import pallas as pl
from jax.experimental.pallas import tpu as pltpu

_MiB = 1024 * 1024


def _tpu_vmem_bytes():
    """Physical VMEM per core; conservative (v7x-sized) fallback."""
    try:
        info = pltpu.get_tpu_info()
        vmem = getattr(info, "vmem_capacity_bytes", None)
        if vmem:
            return int(vmem)
    except Exception:
        pass
    return 64 * _MiB


def _generation_params():
    """Returns (vmem_limit_bytes, tile_budget_bytes, min_grid_steps)."""
    phys = _tpu_vmem_bytes()
    if phys >= 128 * _MiB:
        # v5e / v6e: 128 MiB physical VMEM, 1 TensorCore.
        return 64 * _MiB, 20 * _MiB, 1
    # v7x-like: 64 MiB physical VMEM, 2 TensorCores -> keep scoped VMEM at
    # <=32 MiB and force >=2 grid steps so both cores get work.
    return 32 * _MiB, 12 * _MiB, 2


# ---------------------------------------------------------------------------
# Kernel 1: batched prompt assembly (prefix | ctx | suffix), C_TILE classes
# per grid step.  Matches the PyTorch forward signature (prefix/ctx/suffix).
# ---------------------------------------------------------------------------
def _prompt_assemble_kernel(prefix_ref, ctx_ref, suffix_ref, out_ref):
    """Assemble one tile of C_TILE classes.

    prefix_ref: (C_TILE, 1, D)         VMEM
    ctx_ref:    (n_ctx, D)             VMEM (resident across all grid steps)
    suffix_ref: (C_TILE, n_suffix, D)  VMEM
    out_ref:    (C_TILE, seq, D)       VMEM, seq = 1 + n_ctx + n_suffix
    """
    c_tile = out_ref.shape[0]
    n_ctx = ctx_ref.shape[0]
    n_suffix = suffix_ref.shape[1]

    out_ref[:, 0:1, :] = prefix_ref[...]

    # Per-class ctx store in a loop (not one (c_tile, n_ctx, D) broadcast):
    # keeps vreg pressure flat even for class tiles of hundreds.
    ctx_block = ctx_ref[...]

    def _store_ctx(i, carry):
        out_ref[i, 1:1 + n_ctx, :] = ctx_block
        return carry

    lax.fori_loop(0, c_tile, _store_ctx, 0)

    out_ref[:, 1 + n_ctx:1 + n_ctx + n_suffix, :] = suffix_ref[...]


def prompt_learner_forward(prefix, ctx, suffix, *, c_tile=None):
    """Pallas implementation of PromptLearner.forward().

    Args:
      prefix: (n_cls, 1, D)        token_prefix buffer
      ctx:    (n_ctx, D)           learnable context
      suffix: (n_cls, n_suffix, D) token_suffix buffer
      c_tile: classes per grid step (auto-sized from a generation-aware VMEM
              budget if None)
    Returns:
      prompts: (n_cls, 1 + n_ctx + n_suffix, D)
    """
    n_cls, one, D = prefix.shape
    assert one == 1
    n_ctx, d2 = ctx.shape
    assert d2 == D
    n_cls2, n_suffix, d3 = suffix.shape
    assert n_cls2 == n_cls and d3 == D
    seq = 1 + n_ctx + n_suffix
    dtype = prefix.dtype
    ctx = ctx.astype(dtype)
    itemsize = jnp.dtype(dtype).itemsize

    vmem_limit, budget, min_steps = _generation_params()

    if c_tile is None:
        # Double-buffered (prefix + suffix) inputs and output tile per class.
        per_class = (1 + n_suffix + seq) * D * itemsize * 2
        c_tile = max(1, budget // per_class)
    c_tile = int(min(max(int(c_tile), 1), n_cls, 512))
    if min_steps > 1 and n_cls >= min_steps:
        # v7x: make sure both TensorCores get at least one grid step.
        c_tile = min(c_tile, pl.cdiv(n_cls, min_steps))

    grid = (pl.cdiv(n_cls, c_tile),)  # partial last tile handled by masking

    bytes_accessed = itemsize * (
        n_cls * (1 + n_suffix) * D   # prefix + suffix reads
        + n_ctx * D                  # ctx (VMEM-resident, fetched once)
        + n_cls * seq * D)           # output writes

    grid_spec = pltpu.PrefetchScalarGridSpec(
        num_scalar_prefetch=0,
        grid=grid,
        in_specs=[
            # per-class-tile prefix rows
            pl.BlockSpec((c_tile, 1, D), lambda t: (t, 0, 0)),
            # ctx: constant block index -> one HBM fetch, VMEM-resident
            pl.BlockSpec((n_ctx, D), lambda t: (0, 0)),
            # per-class-tile suffix rows
            pl.BlockSpec((c_tile, n_suffix, D), lambda t: (t, 0, 0)),
        ],
        out_specs=pl.BlockSpec((c_tile, seq, D), lambda t: (t, 0, 0)),
    )

    return pl.pallas_call(
        _prompt_assemble_kernel,
        out_shape=jax.ShapeDtypeStruct((n_cls, seq, D), dtype),
        grid_spec=grid_spec,
        cost_estimate=pl.CostEstimate(
            flops=0, transcendentals=0, bytes_accessed=bytes_accessed),
        compiler_params=pltpu.CompilerParams(
            dimension_semantics=("parallel",),   # v7x: shard classes on 2 TCs
            vmem_limit_bytes=vmem_limit,
        ),
    )(prefix, ctx, suffix)


# ---------------------------------------------------------------------------
# Kernel 2: in-place variant (production path).  The full token embedding is
# aliased to the output; each grid step issues ONE rectangular slab DMA that
# writes the broadcast ctx into rows [1, 1+n_ctx) of c_tile classes.  Prefix
# and suffix bytes never round-trip through the kernel.
# ---------------------------------------------------------------------------
def _make_ctx_slab_kernel(n_cls, n_ctx, c_tile):
    def kernel(ctx_bcast_ref, emb_hbm_ref, out_hbm_ref, sem):
        # emb_hbm_ref is the same HBM buffer as out_hbm_ref (aliased); prefix
        # and suffix rows are simply never touched.
        del emb_hbm_ref
        base = pl.program_id(0) * c_tile
        rem = n_cls - base   # classes remaining in this tile

        @pl.when(rem >= c_tile)
        def _full_tile():
            # One strided rectangular DMA: VMEM ctx slab -> HBM rows
            # [1, 1+n_ctx) of c_tile consecutive classes.
            cp = pltpu.make_async_copy(
                ctx_bcast_ref,
                out_hbm_ref.at[pl.ds(base, c_tile), pl.ds(1, n_ctx), :],
                sem)
            cp.start()
            cp.wait()

        @pl.when(rem < c_tile)
        def _partial_tile():
            # Partial last tile: per-class row slabs, guarded so there is no
            # out-of-bounds DMA and no duplicate concurrent write.
            for i in range(c_tile):
                @pl.when(i < rem)
                def _one(i=i):
                    cp = pltpu.make_async_copy(
                        ctx_bcast_ref.at[pl.ds(i, 1)],
                        out_hbm_ref.at[pl.ds(base + i, 1), pl.ds(1, n_ctx), :],
                        sem)
                    cp.start()
                    cp.wait()

    return kernel


def prompt_learner_forward_inplace(embedding, ctx, *, c_tile=64):
    """In-place prompt assembly.

    Args:
      embedding: (n_cls, seq, D) full token embedding of the tokenized
                 prompts; the 'X' placeholder rows [1, 1+n_ctx) get
                 overwritten by ctx.  Callers should donate this buffer.
      ctx:       (n_ctx, D)
    Returns:
      prompts: (n_cls, seq, D), identical to concat([prefix, ctx, suffix], 1).
    """
    n_cls, seq, D = embedding.shape
    n_ctx, d2 = ctx.shape
    assert d2 == D and seq > 1 + n_ctx
    dtype = embedding.dtype
    ctx = ctx.astype(dtype)
    itemsize = jnp.dtype(dtype).itemsize

    vmem_limit, _, min_steps = _generation_params()

    c_tile = int(min(max(int(c_tile), 1), n_cls))
    if min_steps > 1 and n_cls >= min_steps:
        c_tile = min(c_tile, pl.cdiv(n_cls, min_steps))
    grid = (pl.cdiv(n_cls, c_tile),)

    # Broadcast ctx once, outside the kernel, to a small (c_tile, n_ctx, D)
    # slab; inside the kernel it stays VMEM-resident (constant-index
    # BlockSpec) and is the source of every slab DMA.
    ctx_bcast = jnp.broadcast_to(ctx[None, :, :], (c_tile, n_ctx, D))

    bytes_accessed = itemsize * (
        c_tile * n_ctx * D          # ctx slab read (fetched once)
        + n_cls * n_ctx * D)        # ctx rows written into the aliased buffer

    grid_spec = pltpu.PrefetchScalarGridSpec(
        num_scalar_prefetch=0,
        grid=grid,
        in_specs=[
            pl.BlockSpec((c_tile, n_ctx, D), lambda t: (0, 0, 0)),  # resident
            pl.BlockSpec(memory_space=pl.ANY),        # embedding stays in HBM
        ],
        out_specs=pl.BlockSpec(memory_space=pl.ANY),  # written via manual DMA
        scratch_shapes=[pltpu.SemaphoreType.DMA(())],
    )

    return pl.pallas_call(
        _make_ctx_slab_kernel(n_cls, n_ctx, c_tile),
        out_shape=jax.ShapeDtypeStruct((n_cls, seq, D), dtype),
        grid_spec=grid_spec,
        input_output_aliases={1: 0},   # embedding buffer == output buffer
        cost_estimate=pl.CostEstimate(
            flops=0, transcendentals=0, bytes_accessed=bytes_accessed),
        compiler_params=pltpu.CompilerParams(
            dimension_semantics=("parallel",),
            vmem_limit_bytes=vmem_limit,
        ),
    )(ctx_bcast, embedding)


if __name__ == "__main__":
    # Small deterministic setup mirroring PromptLearner.__init__:
    # n_ctx = 16 context tokens, lane-aligned embedding dim, short prompts.
    n_cls = 10
    n_ctx = 16
    D = 128
    n_suffix = 7
    seq = 1 + n_ctx + n_suffix          # 24
    dtype = jnp.float32

    key = jax.random.PRNGKey(0)
    k_ctx, k_emb = jax.random.split(key)

    # ctx ~ Normal(0, 0.02)  (nn.init.normal_(ctx_vectors, std=0.02))
    ctx = (0.02 * jax.random.normal(k_ctx, (n_ctx, D))).astype(dtype)

    # TODO(synk): the real module runs CLIP's tokenizer + token_embedding in
    # __init__; we substitute a deterministic random embedding of the same
    # shape (the forward pass itself is shape-identical).
    embedding = jax.random.normal(k_emb, (n_cls, seq, D)).astype(dtype)
    token_prefix = embedding[:, :1, :]           # (n_cls, 1, D)
    token_suffix = embedding[:, 1 + n_ctx:, :]   # (n_cls, n_suffix, D)

    # Reference: torch.cat([prefix, ctx, suffix], dim=1)
    ref = jnp.concatenate(
        [token_prefix,
         jnp.broadcast_to(ctx[None, :, :], (n_cls, n_ctx, D)),
         token_suffix],
        axis=1)

    # 1) Batched kernel, auto class tile.
    out1 = jax.block_until_ready(
        prompt_learner_forward(token_prefix, ctx, token_suffix))
    assert out1.shape == (n_cls, seq, D)
    assert jnp.array_equal(out1, ref)

    # 2) Batched kernel with a class tile that does NOT divide n_cls
    #    (exercises the masked partial last tile + multi-step grid).
    out2 = jax.block_until_ready(
        prompt_learner_forward(token_prefix, ctx, token_suffix, c_tile=3))
    assert jnp.array_equal(out2, ref)

    # 3) bf16 path (halves HBM traffic for this bandwidth-bound kernel).
    out3 = jax.block_until_ready(
        prompt_learner_forward(token_prefix.astype(jnp.bfloat16),
                               ctx.astype(jnp.bfloat16),
                               token_suffix.astype(jnp.bfloat16)))
    assert jnp.array_equal(out3, ref.astype(jnp.bfloat16))

    # 4) In-place aliased variant: one rectangular slab DMA per grid step.
    #    (Production: jax.jit(..., donate_argnums=(0,)) to donate `embedding`
    #    and skip the defensive copy; omitted here so the demo input stays
    #    valid for the reference check.)
    out4 = jax.block_until_ready(
        jax.jit(prompt_learner_forward_inplace)(embedding, ctx))
    assert jnp.array_equal(out4, ref)

    # 5) In-place variant with a tile that does NOT divide n_cls
    #    (exercises the pl.when-guarded partial last tile).
    out5 = jax.block_until_ready(
        jax.jit(functools.partial(prompt_learner_forward_inplace, c_tile=4))(
            embedding, ctx))
    assert jnp.array_equal(out5, ref)

    print("KERNEL_OK")
</pallas_src>

<mosaic_0001>
module attributes {stable_mosaic.version = 11 : i64} {
  func.func @_prompt_assemble_kernel(%arg0: i32, %arg1: memref<5x1x128xf32, #tpu.memory_space<vmem>>, %arg2: memref<16x128xf32, #tpu.memory_space<vmem>>, %arg3: memref<5x7x128xf32, #tpu.memory_space<vmem>>, %arg4: memref<5x24x128xf32, #tpu.memory_space<vmem>>) attributes {dimension_semantics = [#tpu.dimension_semantics<parallel>], iteration_bounds = array<i64: 2>, scalar_prefetch = 0 : i64, scratch_operands = 0 : i64, tpu.core_type = #tpu.core_type<tc>, window_params = [{transform_indices = @transform_0, window_bounds = array<i64: 5, 1, 128>}, {pipeline_mode = #tpu.pipeline_mode<synchronous>, transform_indices = @transform_1, window_bounds = array<i64: 16, 128>}, {transform_indices = @transform_2, window_bounds = array<i64: 5, 7, 128>}, {transform_indices = @transform_3, window_bounds = array<i64: 5, 24, 128>}]} {
    %c0 = arith.constant 0 : index
    %c0_0 = arith.constant 0 : index
    %c0_1 = arith.constant 0 : index
    %0 = vector.load %arg1[%c0, %c0_0, %c0_1] : memref<5x1x128xf32, #tpu.memory_space<vmem>>, vector<5x1x128xf32>
    %c0_2 = arith.constant 0 : index
    %c0_3 = arith.constant 0 : index
    %c0_4 = arith.constant 0 : index
    %1 = vector.load %arg4[%c0_2, %c0_3, %c0_4] : memref<5x24x128xf32, #tpu.memory_space<vmem>>, vector<5x1x128xf32>
    tpu.vector_store %arg4[%c0_2, %c0_3, %c0_4], %0 {strides = array<i32>} : memref<5x24x128xf32, #tpu.memory_space<vmem>>, vector<5x1x128xf32>,
    %c0_5 = arith.constant 0 : index
    %c0_6 = arith.constant 0 : index
    %2 = vector.load %arg2[%c0_5, %c0_6] : memref<16x128xf32, #tpu.memory_space<vmem>>, vector<16x128xf32>
    %c0_i32 = arith.constant 0 : i32
    %c5_i32 = arith.constant 5 : i32
    %3 = arith.addi %c0_i32, %c5_i32 : i32
    %c1_i32 = arith.constant 1 : i32
    scf.for %arg5 = %c0_i32 to %3 step %c1_i32  : i32 {
      %6 = arith.index_cast %arg5 : i32 to index
      %c1 = arith.constant 1 : index
      %c0_13 = arith.constant 0 : index
      %7 = vector.load %arg4[%6, %c1, %c0_13] : memref<5x24x128xf32, #tpu.memory_space<vmem>>, vector<1x16x128xf32>
      %8 = vector.shape_cast %7 : vector<1x16x128xf32> to vector<16x128xf32>
      %9 = vector.shape_cast %2 : vector<16x128xf32> to vector<1x16x128xf32>
      tpu.vector_store %arg4[%6, %c1, %c0_13], %9 {strides = array<i32>} : memref<5x24x128xf32, #tpu.memory_space<vmem>>, vector<1x16x128xf32>,
    }
    %c5_i32_7 = arith.constant 5 : i32
    %c0_8 = arith.constant 0 : index
    %c0_9 = arith.constant 0 : index
    %c0_10 = arith.constant 0 : index
    %4 = vector.load %arg3[%c0_8, %c0_9, %c0_10] : memref<5x7x128xf32, #tpu.memory_space<vmem>>, vector<5x7x128xf32>
    %c0_11 = arith.constant 0 : index
    %c17 = arith.constant 17 : index
    %c0_12 = arith.constant 0 : index
    %5 = vector.load %arg4[%c0_11, %c17, %c0_12] : memref<5x24x128xf32, #tpu.memory_space<vmem>>, vector<5x7x128xf32>
    tpu.vector_store %arg4[%c0_11, %c17, %c0_12], %4 {strides = array<i32>} : memref<5x24x128xf32, #tpu.memory_space<vmem>>, vector<5x7x128xf32>,
    return
  }
  func.func @transform_0(%arg0: i32) -> (i32, i32, i32) {
    %c0_i32 = arith.constant 0 : i32
    %c0_i32_0 = arith.constant 0 : i32
    %c0_i32_1 = arith.constant 0 : i32
    return %arg0, %c0_i32, %c0_i32_0 : i32, i32, i32
  }
  func.func @transform_1(%arg0: i32) -> (i32, i32) {
    %c0_i32 = arith.constant 0 : i32
    %c0_i32_0 = arith.constant 0 : i32
    %c0_i32_1 = arith.constant 0 : i32
    return %c0_i32, %c0_i32_0 : i32, i32
  }
  func.func @transform_2(%arg0: i32) -> (i32, i32, i32) {
    %c0_i32 = arith.constant 0 : i32
    %c0_i32_0 = arith.constant 0 : i32
    %c0_i32_1 = arith.constant 0 : i32
    return %arg0, %c0_i32, %c0_i32_0 : i32, i32, i32
  }
  func.func @transform_3(%arg0: i32) -> (i32, i32, i32) {
    %c0_i32 = arith.constant 0 : i32
    %c0_i32_0 = arith.constant 0 : i32
    %c0_i32_1 = arith.constant 0 : i32
    return %arg0, %c0_i32, %c0_i32_0 : i32, i32, i32
  }
}

</mosaic_0001>

<bundles_post_ra>
// kernel: tpu_custom_call.1
= control target key start
LH: loop header
LB: loop body
LE: loop exit
PB: predicated region body
PF: predicated region fallthrough
CT: control target
= control target key end

     0   :  { %8 = vsyncpa [#allocation3], 0  ;;  %s967_s0 = inlined_call_operand.hbm [shape: f32[10,1,128], index: 0, kind: input, shape index: {}]   ;;  %s968_s1 = inlined_call_operand.hbm [shape: f32[16,128], index: 1, kind: input, shape index: {}]   ;;  %s969_s2 = inlined_call_operand.hbm [shape: f32[10,7,128], index: 2, kind: input, shape index: {}]   ;;  %s970_s3 = inlined_call_operand.hbm [shape: f32[10,24,128], index: 3, kind: output, shape index: {}]  }
   0x1   :  { %10 = vsyncpa [#allocation3 + $0x1], 0 }
   0x2   :  { %11 = vsyncpa [#allocation6], 0 }
   0x3   :  { %12 = vsyncpa [#allocation4], 0 }
   0x4   :  { %14 = vsyncpa [#allocation4 + $0x1], 0  ;;  %s699_s12 = smov 0   ;;  %s701_s13 = smov 0  }
   0x5   :  { %s703_s14 = smov 0   ;;  %s705_s15 = smov 0  }
   0x6 LB: > { %s720_s16 = sadd.s32 1, %s663_s15   ;;  %s27_s17 = sadd.s32 1, %s659_s14  ;;  %s663_s15 = sphi %s705_s15, %s997_s15   ;;  %s659_s14 = sphi %s703_s14, %s996_s14   ;;  %s655_s13 = sphi %s701_s13, %s995_s13   ;;  %s651_s12 = sphi %s699_s12, %s994_s12  }
   0x7   : > { %s24_s18 = ssub.s32 %s663_s15, %s720_s16  ;;  %p34_p0 = scmp.ne.s32.totalorder %s659_s14, %s655_s13 }
   0x8   : > { %p25_p1 = scmp.eq.s32.totalorder %s24_s18, 0  ;;  %p35_p2 = scmp.eq.s32.totalorder %s663_s15, 0 }
   0x9   : > { %p446_p4 = scmp.lt.s32.totalorder %s663_s15, 2  ;;  %s150_s20 = sand.u32 1, %s663_s15  }
   0xa   : > { %s731_s19 = scalar_select %p25_p1, %s659_s14, %s27_s17  }
   0xb   : > { %p36_p5 = por %p35_p2, %p34_p0  ;;  %s152_s21 = sand.u32 1, %s659_s14  }
   0xc   : > { %s414_s22 = smul.u32 5, %s152_s21  ;;  %s752_s30 = scalar_lea.sflag [#allocation3], %s150_s20 }
   0xd   : > { %p740_p6 = pnand %p446_p4, %p36_p5  ;;  %s412_s24 = smul.u32 80, %s663_s15 }
   0xe   : > { %s154_s28 = scalar_lea.vmem [#allocation2], %s414_s22  ;;  %s502_s7 = scalar_lea.hbm %s967_s0, 160 }
   0xf   : > { %s978_s23 = scalar_select %p740_p6, 1, 0 }
  0x10   : > { %s748_s27 = scalar_lea.hbm %s967_s0, %s412_s24  ;;  %s161_s29 = sshll.u32 %s154_s28, 4  ;;  %s750_s29 = int_to_ptr.vmem [resolvable:$true] %s161_s29 }
  0x11   : > { %s497_s4 = scalar_lea.hbm %s748_s27, 80  ;;  %p972_p8 = pneg %p740_p6 }
  0x12   : > { %p498_p7 = scmp.ne.s32.totalorder %s748_s27, %s497_s4  ;;  %p503_p11 = scmp.lt.u32.totalorder %s748_s27, %s967_s0 }
  0x13   : > { %p504_p12 = scmp.lt.u32.totalorder %s502_s7, %s497_s4  ;;  %p506_p1 = scmp.lt.u32.totalorder %s497_s4, %s748_s27 }
  0x14   : > { %p500_p9 = pnand %p972_p8, %p498_p7 }
  0x15   : > { %p505_p13 = por %p504_p12, %p503_p11 }
  0x16   : > { %p501_p10 = pneg %p500_p9 }
  0x17   : > { %p507_p2 = por %p506_p1, %p505_p13 }
  0x19   : > { %p508_p4 = pnand %p507_p2, %p501_p10 }
  0x1b   : > { %511 = shalt.err (!%p508_p4)
}
  0x1c   : > { %s512_s10 = scalar_lea.vmem %s750_s29, 80  ;;  %s669_s11 = smov [#allocation2]  }
  0x1d   : > { %p513_p5 = scmp.ne.s32.totalorder %s750_s29, %s512_s10  ;;  %s517_s17 = sshll.u32 %s669_s11, 4  ;;  %s518_s17 = int_to_ptr.vmem [resolvable:$false] %s517_s17 }
  0x1e   : > { %s519_s18 = scalar_lea.vmem %s518_s17, 160  ;;  %p520_p3 = scmp.lt.s32.totalorder %s750_s29, %s518_s17 }
  0x1f   : > { %p515_p7 = pnand %p513_p5, %p972_p8  ;;  %p521_p11 = scmp.lt.s32.totalorder %s519_s18, %s512_s10 }
  0x21   : > { %p516_p9 = pneg %p515_p7  ;;  %p522_p12 = por %p521_p11, %p520_p3 }
  0x23   : > { %p523_p13 = pnand %p522_p12, %p516_p9 }
  0x25   : > { %526 = shalt.err (!%p523_p13)
}
  0x26   : > { %s670_s20 = smov 16   ;;  %s671_s22 = smov 1  }
  0x27   : > { %437 = dma.hbm_to_vmem [thread:$0]  (!%p740_p6), %s748_s27, 80, %s750_s29, %s752_s30, %s670_s20, %s670_s20, %s671_s22  }
  0x28   : > { %s781_s24 = sadd.s32 4294967295, %s663_s15   ;;  %s415_s25 = smul.u32 40, %s152_s21 }
  0x29   : > { %s401_s26 = sadd.s32 4294967294, %s663_s15   ;;  %p40_p3 = scmp.ne.s32.totalorder %s655_s13, %s651_s12 }
  0x2a   : > { %p971_p10 = scmp.eq.s32.totalorder %s781_s24, 0  ;;  %p111_p1 = scmp.eq.s32.totalorder %s781_s24, 1 }
  0x2b   : > { %p117_p2 = scmp.eq.s32.totalorder %s401_s26, 1  ;;  %p402_p5 = scmp.ge.s32.totalorder %s663_s15, 1 }
  0x2c   : > { %p792_p4 = por %p971_p10, %p40_p3  ;;  %p800_p7 = por %p111_p1, %p34_p0 }
  0x2d   : > { %p804_p9 = por %p117_p2, %p40_p3  ;;  %p124_p11 = scmp.lt.s32.totalorder %s663_s15, 3 }
  0x2e   : > { %s979_s28 = scalar_select %p792_p4, 1, 0 }
  0x2f   : > { %s980_s27 = scalar_select %p800_p7, 1, 0 }
  0x30   : > { %s981_s29 = scalar_select %p804_p9, 1, 0 }
  0x31   : > { %p809_p12 = pnand %p402_p5, %p124_p11  ;;  %s672_s4 = smov [#allocation5]  }
  0x32   : > { %s136_s5 = sshll.u32 %s672_s4, 4  ;;  %s413_s6 = smul.u32 640, %s663_s15  ;;  %s137_s5 = int_to_ptr.vmem [resolvable:$true] %s136_s5 }
  0x33   : > { %s982_s21 = scalar_select %p809_p12, 1, 0 }
  0x34   : > { %p430_p13 = pneg %p809_p12  ;;  %s175_s7 = scalar_lea.vmem [#allocation7], %s415_s25 }
  0x35   : > { %s182_s8 = sshll.u32 %s175_s7, 4  ;;  %s825_s17 = scalar_lea.hbm %s969_s2, %s413_s6  ;;  %s827_s8 = int_to_ptr.vmem [resolvable:$true] %s182_s8 }
  0x36   : > { %p818_p0 = pnand %p430_p13, %p971_p10  ;;  %s527_s22 = scalar_lea.hbm %s968_s1, 256 }
  0x37   : > { %p528_p3 = scmp.ne.s32.totalorder %s968_s1, %s527_s22  ;;  %p534_p11 = scmp.lt.u32.totalorder %s527_s22, %s968_s1 }
  0x38   : > { %p529_p1 = pneg %p818_p0 }
  0x3a   : > { %p530_p2 = pnand %p529_p1, %p528_p3 }
  0x3c   : > { %p531_p5 = pneg %p530_p2 }
  0x3e   : > { %p536_p13 = pnand %p534_p11, %p531_p5 }
  0x40   : > { %539 = shalt.err (!%p536_p13)
}
  0x41   : > { %s540_s6 = scalar_lea.vmem %s137_s5, 256  ;;  %p548_p7 = scmp.lt.s32.totalorder %s137_s5, %s137_s5 }
  0x42   : > { %p541_p10 = scmp.ne.s32.totalorder %s137_s5, %s540_s6  ;;  %p549_p4 = scmp.lt.s32.totalorder %s540_s6, %s540_s6 }
  0x44   : > { %p543_p8 = pnand %p541_p10, %p529_p1  ;;  %p550_p12 = por %p549_p4, %p548_p7 }
  0x46   : > { %p544_p9 = pneg %p543_p8 }
  0x48   : > { %p551_p6 = pnand %p550_p12, %p544_p9 }
  0x4a   : > { %554 = shalt.err (!%p551_p6)
}
  0x4b   : > { %s673_s10 = smov 128   ;;  %s674_s11 = smov 8  }
  0x4c   : > { %433 = dma.hbm_to_vmem [thread:$0]  (!%p818_p0), %s968_s1, 256, %s137_s5, [#allocation6], %s673_s10, %s673_s10, %s674_s11  }
  0x4d   : > { %s555_s22 = scalar_lea.hbm %s825_s17, 640  ;;  %p984_p10 = scmp.ne.s32.totalorder %s978_s23, 0 }
  0x4e   : > { %p556_p8 = scmp.ne.s32.totalorder %s825_s17, %s555_s22  ;;  %s560_s4 = scalar_lea.hbm %s969_s2, 1280 }
  0x4f   : > { %p985_p6 = pneg %p984_p10  ;;  %p561_p9 = scmp.lt.u32.totalorder %s825_s17, %s969_s2 }
  0x50   : > { %p562_p12 = scmp.lt.u32.totalorder %s560_s4, %s555_s22  ;;  %p564_p1 = scmp.lt.u32.totalorder %s555_s22, %s825_s17 }
  0x51   : > { %p558_p4 = pnand %p556_p8, %p985_p6 }
  0x52   : > { %p563_p3 = por %p562_p12, %p561_p9 }
  0x53   : > { %p559_p7 = pneg %p558_p4 }
  0x54   : > { %p565_p2 = por %p564_p1, %p563_p3 }
  0x56   : > { %p566_p5 = pnand %p565_p2, %p559_p7 }
  0x58   : > { %569 = shalt.err (!%p566_p5)
}
  0x59   : > { %s570_s5 = scalar_lea.vmem %s827_s8, 640  ;;  %p986_p11 = pmov %p985_p6 }
  0x5a   : > { %p571_p0 = scmp.ne.s32.totalorder %s827_s8, %s570_s5  ;;  %s675_s9 = smov [#allocation7]  }
  0x5b   : > { %s575_s18 = sshll.u32 %s675_s9, 4  ;;  %s576_s18 = int_to_ptr.vmem [resolvable:$false] %s575_s18 }
  0x5c   : > { %p573_p13 = pnand %p571_p0, %p986_p11  ;;  %s577_s20 = scalar_lea.vmem %s576_s18, 1280 }
  0x5d   : > { %p578_p6 = scmp.lt.s32.totalorder %s827_s8, %s576_s18  ;;  %p579_p4 = scmp.lt.s32.totalorder %s577_s20, %s570_s5 }
  0x5e   : > { %p574_p8 = pneg %p573_p13 }
  0x5f   : > { %p580_p9 = por %p579_p4, %p578_p6 }
  0x61   : > { %p581_p12 = pnand %p580_p9, %p574_p8 }
  0x63   : > { %584 = shalt.err (!%p581_p12)
}
  0x64   : > { %440 = dma.hbm_to_vmem [thread:$0]  (!%p984_p10), %s825_s17, 640, %s827_s8, %s752_s30, %s673_s10, %s673_s10, %s674_s11  }
  0x65   : > { %p987_p7 = scmp.ne.s32.totalorder %s982_s21, 0 }
  0x66   : > { %s196_s22 = sand.u32 (!%p987_p7), 1, %s781_s24   ;;  %s879_s26 = sand.u32 (!%p987_p7), 1, %s655_s13  }
  0x67   : > { %194 = sbr.rel (%p987_p7) target bundleno = 155 (0x9b), region = 32  ;;  %s197_s4 = scalar_lea.sflag (!%p987_p7), [#allocation3], %s196_s22 }
  0x68   : > { %s416_s25 = smul.u32 (!%p987_p7), 5, %s879_s26  ;;  %p988_p3 = scmp.ne.s32.totalorder (!%p987_p7), %s979_s28, 0 }
  0x6a   : > { %s200_s23 = scalar_lea.vmem (!%p987_p7), [#allocation2], %s416_s25 }
  0x6e   : > { %634 = dma.done.wait (%p988_p3), %s197_s4, 80  }
  0x6f   : > { %636 = vsyncadd (%p988_p3), %s197_s4, 4294967216  ;;  %p989_p10 = scmp.eq.s32.totalorder %s781_s24, 0 }
  0x71   : > { %638 = dma.done.wait (%p989_p10), [#allocation6], 256   ;;  %p990_p1 = pmov %p989_p10 }
  0x72   : > { %s417_s30 = smul.u32 40, %s879_s26 }
  0x73   : > { %640 = vsyncadd (%p990_p1), [#allocation6], 4294967040 }
  0x74   : > { %s891_s21 = scalar_lea.vmem [#allocation7], %s417_s30 }
  0x75   : > { %642 = dma.done.wait (%p988_p3), %s197_s4, 640  }
  0x76   : > { %644 = vsyncadd (%p988_p3), %s197_s4, 4294966656  ;;  %s418_s8 = smul.u32 120, %s879_s26  ;;  %v254_v0 = vld [vmem:[#allocation5] sm:$0xff]  ;;  %v255_v1 = vld [vmem:[#allocation5 + $0x8] sm:$0xff]  ;;  %s665_s28 = smov 0  }
  0x77   : > { %v244_v2 = vld [vmem:[%s200_s23] sm:$0x1]  ;;  %v245_v3 = vld [vmem:[%s200_s23 + $0x1] sm:$0x1]  ;;  %v246_v4 = vld [vmem:[%s200_s23 + $0x2] sm:$0x1] }
  0x78   : > { %s898_s17 = scalar_lea.vmem [#allocation8], %s418_s8  ;;  %v247_v5 = vld [vmem:[%s200_s23 + $0x3] sm:$0x1]  ;;  %v248_v6 = vld [vmem:[%s200_s23 + $0x4] sm:$0x1] }
  0x79   : > { %249 = vst [vmem:[%s898_s17] sm:$0x1] %v244_v2  ;;  %250 = vst [vmem:[%s898_s17 + $0x18] sm:$0x1] %v245_v3 }
  0x7a   : > { %251 = vst [vmem:[%s898_s17 + $0x30] sm:$0x1] %v246_v4  ;;  %252 = vst [vmem:[%s898_s17 + $0x48] sm:$0x1] %v247_v5 }
  0x7b   : > { %253 = vst [vmem:[%s898_s17 + $0x60] sm:$0x1] %v248_v6 }
  0x7c LB: >> { %s262_s10 = smul.u32 24, %s667_s28  ;;  %s261_s28 = sadd.s32 1, %s667_s28   ;;  %s667_s28 = sphi %s665_s28, %s261_s28  }
  0x7d   : >> { %p258_p2 = scmp.ge.s32.totalorder %s261_s28, 5  }
  0x7e   : >> { %s263_s11 = scalar_lea.vmem %s898_s17, %s262_s10 [#allocation8]  ;;  %v266_v7 = vld [vmem:[%s891_s21] sm:$0x7f] (%p258_p2)  ;;  %v267_v8 = vld [vmem:[%s891_s21 + $0x8] sm:$0x7f] (%p258_p2)  ;;  %v268_v9 = vld [vmem:[%s891_s21 + $0x10] sm:$0x7f] (%p258_p2) }
  0x7f   : >> { %264 = vst [vmem:[%s263_s11 + $0x1] sm:$0xff] %v254_v0  ;;  %265 = vst [vmem:[%s263_s11 + $0x9] sm:$0xff] %v255_v1  ;;  %260 = sbr.rel (!%p258_p2) target bundleno = 124 (0x7c), region = 100  ;;  %v269_v10 = vld [vmem:[%s891_s21 + $0x18] sm:$0x7f] (%p258_p2)  ;;  %s291_s6 = sshll.u32 (%p258_p2), %s898_s17, 4  ;;  %s918_s6 = int_to_ptr.vmem [resolvable:$true] %s291_s6 }
  0x80   : > { %271 = vst [vmem:[%s898_s17 + $0x11] sm:$0x7f] (%p258_p2), %v266_v7  ;;  %272 = vst [vmem:[%s898_s17 + $0x29] sm:$0x7f] (%p258_p2), %v267_v8  ;;  %v270_v11 = vld [vmem:[%s891_s21 + $0x20] sm:$0x7f] (%p258_p2) }
  0x81   : > { %273 = vst [vmem:[%s898_s17 + $0x41] sm:$0x7f] (%p258_p2), %v268_v9  ;;  %274 = vst [vmem:[%s898_s17 + $0x59] sm:$0x7f] (%p258_p2), %v269_v10  ;;  %s448_s7 = smul.u32 (%p258_p2), 1920, %s781_s24  ;;  %s277_s20 = scalar_lea.sflag (%p258_p2), [#allocation4], %s879_s26 }
  0x82   : > { %275 = vst [vmem:[%s898_s17 + $0x71] sm:$0x7f] (%p258_p2), %v270_v11  ;;  %s585_s22 = scalar_lea.vmem (%p258_p2), %s918_s6, 1920  ;;  %p991_p0 = scmp.ne.s32.totalorder (%p258_p2), %s980_s27, 0 }
  0x83   : > { %s923_s18 = scalar_lea.hbm (%p258_p2), %s970_s3, %s448_s7  ;;  %p586_p5 = scmp.ne.s32.totalorder (%p258_p2), %s918_s6, %s585_s22 }
  0x84   : > { %s676_s25 = smov (%p258_p2), [#allocation8]  }
  0x85   : > { %p587_p11 = pnand (%p258_p2), %p586_p5, %p991_p0  ;;  %s589_s4 = sshll.u32 (%p258_p2), %s676_s25, 4  ;;  %s590_s4 = int_to_ptr.vmem [resolvable:$false] %s589_s4 }
  0x86   : > { %s591_s24 = scalar_lea.vmem %s590_s4, 3840  ;;  %p592_p8 = scmp.lt.s32.totalorder %s918_s6, %s590_s4 }
  0x87   : > { %p588_p13 = pneg %p587_p11  ;;  %p593_p6 = scmp.lt.s32.totalorder %s591_s24, %s585_s22 }
  0x89   : > { %p594_p4 = por %p593_p6, %p592_p8 }
  0x8b   : > { %p595_p9 = pnand %p594_p4, %p588_p13 }
  0x8d   : > { %598 = shalt.err (!%p595_p9)
}
  0x8e   : > { %s599_s23 = scalar_lea.hbm %s923_s18, 1920  ;;  %s603_s8 = scalar_lea.hbm %s970_s3, 3840 }
  0x8f   : > { %p600_p12 = scmp.ne.s32.totalorder %s923_s18, %s599_s23  ;;  %p604_p10 = scmp.lt.u32.totalorder %s923_s18, %s970_s3 }
  0x90   : > { %p605_p1 = scmp.lt.u32.totalorder %s603_s8, %s599_s23  ;;  %p607_p5 = scmp.lt.u32.totalorder %s599_s23, %s923_s18 }
  0x91   : > { %p601_p7 = pnand %p600_p12, %p991_p0 }
  0x92   : > { %p606_p2 = por %p605_p1, %p604_p10 }
  0x93   : > { %p602_p3 = pneg %p601_p7 }
  0x94   : > { %p608_p11 = por %p607_p5, %p606_p2 }
  0x96   : > { %p609_p13 = pnand %p608_p11, %p602_p3 }
  0x98   : > { %612 = shalt.err (!%p609_p13)
}
  0x99   : > { %s677_s10 = smov 128   ;;  %s678_s11 = smov 8  }
  0x9a   : > { %428 = dma.vmem_to_hbm [thread:$0]  (%p991_p0), %s918_s6, 1920, %s923_s18, %s277_s20, %s677_s10, %s677_s10, %s678_s11  }
  0x9b PF: > { %s306_s7 = sand.u32 1, %s651_s12   ;;  %p992_p8 = scmp.ne.s32.totalorder %s981_s29, 0 }
  0x9c   : > { %p993_p6 = scmp.ge.s32.totalorder %s663_s15, 2  ;;  %s307_s5 = scalar_lea.sflag [#allocation4], %s306_s7 }
  0x9e   : > { %p442_p4 = pnand %p993_p6, %p992_p8 }
  0xa0   : > { %646 = dma.done.wait (!%p442_p4), %s307_s5, 1920  }
  0xa1   : > { %648 = vsyncadd (!%p442_p4), %s307_s5, 4294965376  ;;  %p17_p9 = scmp.ge.s32.totalorder %s720_s16, 4   ;;  %s994_s12 = smov %s655_s13 }
  0xa2   : > { %s995_s13 = smov %s659_s14  ;;  %s996_s14 = smov %s731_s19 }
  0xa3   : > { %s997_s15 = smov %s720_s16  ;;  %19 = sbr.rel (!%p17_p9) target bundleno = 6 (0x6), region = 111 }
  0xaa   :  { %312 = vsyncpa [#allocation3], 1 }
  0xab   :  { %314 = vsyncpa [#allocation3 + $0x1], 1 }
  0xac   :  { %315 = vsyncpa [#allocation6], 1 }
  0xad   :  { %316 = vsyncpa [#allocation4], 1 }
  0xae   :  { %318 = vsyncpa [#allocation4 + $0x1], 1 }

</bundles_post_ra>
